<compile_context>
chip_gen: v6e
topology: v6e:2x2x1
jax: 0.10.0
libtpu: 0.0.40
codegen_flags: <defaults>
</compile_context>

<pallas_src>
import functools

import jax
import jax.numpy as jnp
from jax.experimental import pallas as pl
from jax.experimental.pallas import tpu as pltpu

BN_EPS = 1e-5


def _round_up(n, m):
    return ((n + m - 1) // m) * m


def _vmem_budget_bytes():
    """Generation-aware usable-VMEM budget (leaves ~1/4 headroom for compiler scratch)."""
    try:
        cap = int(pltpu.get_tpu_info().vmem_capacity_bytes)
    except Exception:
        cap = 64 << 20  # conservative (v7x per-TC VMEM)
    return (cap * 3) // 4


def _use_bf16_activations():
    """bf16 tanh path only on chips with a bf16 VPU/EUP (v6e, v7x); f32 on v5e and older."""
    try:
        kind = jax.devices()[0].device_kind.lower()
    except Exception:
        return False
    return not any(t in kind for t in ("v2", "v3", "v4", "v5"))


# ---------------------------------------------------------------------------
# Kernels
# ---------------------------------------------------------------------------
def mlp_kernel_fused(x_ref, w1_ref, b1_ref, w2_ref, b2_ref, o_ref, *, bf16_act):
    # fc1: (TB, Din) @ (Din, H) on the MXU, bf16 operands, f32 accumulation.
    h = jnp.dot(x_ref[...], w1_ref[...], preferred_element_type=jnp.float32)
    h = h + b1_ref[...]
    if bf16_act:
        h = jnp.tanh(h.astype(jnp.bfloat16))          # bf16 EUP path (v6e/v7x)
    else:
        h = jnp.tanh(h).astype(jnp.bfloat16)          # f32 EUP (v5e), cast for MXU
    # fc2 (BatchNorm already folded into w2/b2).
    y = jnp.dot(h, w2_ref[...], preferred_element_type=jnp.float32)
    # dropout: identity in eval mode.
    o_ref[...] = jnp.maximum(y + b2_ref[...], 0.0).astype(o_ref.dtype)


def mlp_kernel_htiled(x_ref, w1_ref, b1_ref, w2_ref, b2_ref, o_ref, acc_ref, *, bf16_act):
    # Hidden-dim tiled fallback: per-H-chunk tanh(fc1) then partial fc2 sums into acc.
    hj = pl.program_id(1)

    @pl.when(hj == 0)
    def _():
        acc_ref[...] = jnp.zeros_like(acc_ref)

    h = jnp.dot(x_ref[...], w1_ref[...], preferred_element_type=jnp.float32) + b1_ref[...]
    if bf16_act:
        h = jnp.tanh(h.astype(jnp.bfloat16))
    else:
        h = jnp.tanh(h).astype(jnp.bfloat16)
    acc_ref[...] += jnp.dot(h, w2_ref[...], preferred_element_type=jnp.float32)

    @pl.when(hj == pl.num_programs(1) - 1)
    def _():
        o_ref[...] = jnp.maximum(acc_ref[...] + b2_ref[...], 0.0).astype(o_ref.dtype)


# ---------------------------------------------------------------------------
# One-time parameter preparation (BN fold + padding + bf16 casts)
# ---------------------------------------------------------------------------
def prepare_params(params):
    (w1, b1, gamma, beta, rm, rv, w2, b2) = params
    D_in, H = w1.shape
    D_out = w2.shape[1]

    gamma = gamma.reshape(1, H)
    beta = beta.reshape(1, H)
    rm = rm.reshape(1, H)
    rv = rv.reshape(1, H)

    # Exact eval-mode BN fold into fc2 (done once, in f32).
    scale = gamma * jax.lax.rsqrt(rv + BN_EPS)        # (1, H)
    shift = beta - rm * scale                         # (1, H)
    w2f = w2 * scale.reshape(H, 1)                    # (H, D_out)
    b2f = shift @ w2 + b2.reshape(1, D_out)           # (1, D_out)

    D_in_p = _round_up(D_in, 128)
    H_p = _round_up(H, 128)
    D_out_p = _round_up(D_out, 128)

    w1p = jnp.zeros((D_in_p, H_p), jnp.bfloat16).at[:D_in, :H].set(w1.astype(jnp.bfloat16))
    b1p = jnp.zeros((1, H_p), jnp.float32).at[:, :H].set(b1.reshape(1, H).astype(jnp.float32))
    w2p = jnp.zeros((H_p, D_out_p), jnp.bfloat16).at[:H, :D_out].set(w2f.astype(jnp.bfloat16))
    b2p = jnp.zeros((1, D_out_p), jnp.float32).at[:, :D_out].set(b2f)

    return dict(w1p=w1p, b1p=b1p, w2p=w2p, b2p=b2p,
                dims=(D_in, H, D_out), padded=(D_in_p, H_p, D_out_p))


# ---------------------------------------------------------------------------
# Tile planning
# ---------------------------------------------------------------------------
def _plan_tiles(B8, d_in_p, h_p, d_out_p, budget):
    # Fused path: both bf16 weight matrices resident, single-buffered (Buffered(1)).
    resident = d_in_p * h_p * 2 + h_p * d_out_p * 2 + h_p * 4 + d_out_p * 4
    if resident <= budget // 2:
        # Per-row: 2x bf16 x block, 2x bf16 out block, live f32 h + its bf16 copy.
        per_row = 2 * d_in_p * 2 + 2 * d_out_p * 2 + h_p * 4 + h_p * 2
        avail = budget - resident
        tile_b = max(8, min(2048, (avail // per_row) // 8 * 8))
        return min(tile_b, B8), None

    # Hidden-dim-tiled fallback (weights streamed in H chunks).
    tile_b = min(B8, 512)
    tile_h = 0
    while True:
        fixed = (2 * tile_b * d_in_p * 2 + 2 * tile_b * d_out_p * 2
                 + tile_b * d_out_p * 4 + d_out_p * 4)
        per_h = 2 * d_in_p * 2 + 2 * 4 + 2 * d_out_p * 2 + tile_b * 6
        avail = budget - fixed
        tile_h = (avail // per_h) // 128 * 128 if avail > 0 else 0
        if tile_h >= 128 or tile_b <= 8:
            break
        tile_b = max(8, (tile_b // 2) // 8 * 8)
    tile_h = max(128, min(tile_h, h_p))
    while h_p % tile_h != 0:
        tile_h -= 128
    return tile_b, tile_h


# ---------------------------------------------------------------------------
# Forward
# ---------------------------------------------------------------------------
def mlp_forward(x, prepped, *, tile_b=None, tile_h=None, force_htiled=False):
    w1p, b1p, w2p, b2p = prepped["w1p"], prepped["b1p"], prepped["w2p"], prepped["b2p"]
    D_in, H, D_out = prepped["dims"]
    D_in_p, H_p, D_out_p = prepped["padded"]

    B = x.shape[0]
    assert x.shape[1] == D_in

    budget = _vmem_budget_bytes()
    bf16_act = _use_bf16_activations()

    B8 = _round_up(B, 8)
    auto_tb, auto_th = _plan_tiles(B8, D_in_p, H_p, D_out_p, budget)
    if tile_b is None:
        tile_b = auto_tb
    tile_b = max(8, _round_up(min(tile_b, B8), 8))
    if tile_h is None:
        tile_h = 128 if (force_htiled and auto_th is None) else auto_th

    # Keep >=2 batch tiles when possible so the "parallel" batch axis shards across
    # both TensorCores on v7x (and pipelines on single-TC chips).
    if B8 >= 16 and B8 // tile_b < 2:
        tile_b = min(tile_b, _round_up((B8 + 1) // 2, 8))

    B_p = _round_up(B8, tile_b)
    xp = jnp.zeros((B_p, D_in_p), jnp.bfloat16).at[:B, :D_in].set(x.astype(jnp.bfloat16))

    cost = pl.CostEstimate(
        flops=2 * B_p * H_p * (D_in_p + D_out_p),
        transcendentals=B_p * H_p,
        bytes_accessed=int(xp.size * 2 + w1p.size * 2 + w2p.size * 2
                           + b1p.size * 4 + b2p.size * 4 + B_p * D_out_p * 2),
    )
    out_shape = jax.ShapeDtypeStruct((B_p, D_out_p), jnp.bfloat16)

    if tile_h is None:
        # ---- Fused path: weights fully resident, single grid axis over batch ----
        kernel = functools.partial(mlp_kernel_fused, bf16_act=bf16_act)
        out_p = pl.pallas_call(
            kernel,
            out_shape=out_shape,
            grid_spec=pltpu.PrefetchScalarGridSpec(
                num_scalar_prefetch=0,
                grid=(B_p // tile_b,),
                in_specs=[
                    pl.BlockSpec((tile_b, D_in_p), lambda i: (i, 0)),
                    pl.BlockSpec((D_in_p, H_p), lambda i: (0, 0),
                                 pipeline_mode=pl.Buffered(1)),
                    pl.BlockSpec((1, H_p), lambda i: (0, 0),
                                 pipeline_mode=pl.Buffered(1)),
                    pl.BlockSpec((H_p, D_out_p), lambda i: (0, 0),
                                 pipeline_mode=pl.Buffered(1)),
                    pl.BlockSpec((1, D_out_p), lambda i: (0, 0),
                                 pipeline_mode=pl.Buffered(1)),
                ],
                out_specs=pl.BlockSpec((tile_b, D_out_p), lambda i: (i, 0)),
            ),
            compiler_params=pltpu.CompilerParams(
                dimension_semantics=("parallel",),
                vmem_limit_bytes=int(budget),
            ),
            cost_estimate=cost,
        )(xp, w1p, b1p, w2p, b2p)
    else:
        # ---- Hidden-dim-tiled fallback: weights streamed in H chunks ----
        kernel = functools.partial(mlp_kernel_htiled, bf16_act=bf16_act)
        out_p = pl.pallas_call(
            kernel,
            out_shape=out_shape,
            grid_spec=pltpu.PrefetchScalarGridSpec(
                num_scalar_prefetch=0,
                grid=(B_p // tile_b, H_p // tile_h),
                in_specs=[
                    pl.BlockSpec((tile_b, D_in_p), lambda i, j: (i, 0)),
                    pl.BlockSpec((D_in_p, tile_h), lambda i, j: (0, j)),
                    pl.BlockSpec((1, tile_h), lambda i, j: (0, j)),
                    pl.BlockSpec((tile_h, D_out_p), lambda i, j: (j, 0)),
                    pl.BlockSpec((1, D_out_p), lambda i, j: (0, 0),
                                 pipeline_mode=pl.Buffered(1)),
                ],
                out_specs=pl.BlockSpec((tile_b, D_out_p), lambda i, j: (i, 0)),
                scratch_shapes=[pltpu.VMEM((tile_b, D_out_p), jnp.float32)],
            ),
            compiler_params=pltpu.CompilerParams(
                dimension_semantics=("parallel", "arbitrary"),
                vmem_limit_bytes=int(budget),
            ),
            cost_estimate=cost,
        )(xp, w1p, b1p, w2p, b2p)

    return out_p[:B, :D_out].astype(jnp.float32)


# ---------------------------------------------------------------------------
# Synthetic params + pure-JAX reference
# ---------------------------------------------------------------------------
def init_params(key, input_dim, hidden_dim, out_dim):
    """Deterministic synthetic parameters (PyTorch-style uniform init for Linear)."""
    k1, k2, k3, k4, k5, k6, k7, k8 = jax.random.split(key, 8)
    lim1 = 1.0 / jnp.sqrt(input_dim)
    lim2 = 1.0 / jnp.sqrt(hidden_dim)
    # nn.Linear weights are (out, in); stored transposed for the kernel.
    w1 = jax.random.uniform(k1, (input_dim, hidden_dim), jnp.float32, -lim1, lim1)
    b1 = jax.random.uniform(k2, (1, hidden_dim), jnp.float32, -lim1, lim1)
    w2 = jax.random.uniform(k3, (hidden_dim, out_dim), jnp.float32, -lim2, lim2)
    b2 = jax.random.uniform(k4, (1, out_dim), jnp.float32, -lim2, lim2)
    # BatchNorm1d affine params + (synthetic, non-trivial) running stats.
    gamma = 1.0 + 0.1 * jax.random.normal(k5, (1, hidden_dim), jnp.float32)
    beta = 0.1 * jax.random.normal(k6, (1, hidden_dim), jnp.float32)
    rm = 0.05 * jax.random.normal(k7, (1, hidden_dim), jnp.float32)
    rv = 1.0 + 0.1 * jax.random.uniform(k8, (1, hidden_dim), jnp.float32)
    return (w1, b1, gamma, beta, rm, rv, w2, b2)


def mlp_reference(x, params):
    (w1, b1, gamma, beta, rm, rv, w2, b2) = params
    h = jnp.tanh(x @ w1 + b1)
    h = (h - rm) / jnp.sqrt(rv + BN_EPS) * gamma + beta
    return jnp.maximum(h @ w2 + b2, 0.0)


if __name__ == "__main__":
    # Small shapes consistent with the module (hidden_dim default 256).
    B, INPUT_DIM, HIDDEN_DIM, OUT_DIM = 16, 64, 256, 10

    key = jax.random.PRNGKey(0)
    kx, kp = jax.random.split(key)
    x = jax.random.normal(kx, (B, INPUT_DIM), jnp.float32)
    params = init_params(kp, INPUT_DIM, HIDDEN_DIM, OUT_DIM)
    prepped = prepare_params(params)

    ref = mlp_reference(x, params)

    out = jax.block_until_ready(mlp_forward(x, prepped))
    assert out.shape == (B, OUT_DIM)
    # bf16 MXU operands / bf16 output store (f32 accumulation) -> looser tolerance.
    assert jnp.allclose(out, ref, atol=5e-2, rtol=5e-2), "fused-path mismatch vs JAX reference"

    # Also exercise the hidden-dim-tiled fallback (used when weights exceed VMEM).
    out_ht = jax.block_until_ready(mlp_forward(x, prepped, force_htiled=True, tile_h=128))
    assert out_ht.shape == (B, OUT_DIM)
    assert jnp.allclose(out_ht, ref, atol=5e-2, rtol=5e-2), "h-tiled-path mismatch vs JAX reference"

    print("KERNEL_OK")
</pallas_src>

<mosaic_0001>
module attributes {stable_mosaic.version = 11 : i64} {
  func.func @mlp_kernel_fused(%arg0: i32, %arg1: memref<8x128xbf16, #tpu.memory_space<vmem>>, %arg2: memref<128x256xbf16, #tpu.memory_space<vmem>>, %arg3: memref<1x256xf32, #tpu.memory_space<vmem>>, %arg4: memref<256x128xbf16, #tpu.memory_space<vmem>>, %arg5: memref<1x128xf32, #tpu.memory_space<vmem>>, %arg6: memref<8x128xbf16, #tpu.memory_space<vmem>>) attributes {dimension_semantics = [#tpu.dimension_semantics<parallel>], iteration_bounds = array<i64: 2>, scalar_prefetch = 0 : i64, scratch_operands = 0 : i64, tpu.core_type = #tpu.core_type<tc>, window_params = [{transform_indices = @transform_0, window_bounds = array<i64: 8, 128>}, {pipeline_mode = #tpu.pipeline_mode<synchronous>, transform_indices = @transform_1, window_bounds = array<i64: 128, 256>}, {pipeline_mode = #tpu.pipeline_mode<synchronous>, transform_indices = @transform_2, window_bounds = array<i64: 1, 256>}, {pipeline_mode = #tpu.pipeline_mode<synchronous>, transform_indices = @transform_3, window_bounds = array<i64: 256, 128>}, {pipeline_mode = #tpu.pipeline_mode<synchronous>, transform_indices = @transform_4, window_bounds = array<i64: 1, 128>}, {transform_indices = @transform_5, window_bounds = array<i64: 8, 128>}]} {
    %c0 = arith.constant 0 : index
    %c0_0 = arith.constant 0 : index
    %0 = vector.load %arg1[%c0, %c0_0] : memref<8x128xbf16, #tpu.memory_space<vmem>>, vector<8x128xbf16>
    %c0_1 = arith.constant 0 : index
    %c0_2 = arith.constant 0 : index
    %1 = vector.load %arg2[%c0_1, %c0_2] : memref<128x256xbf16, #tpu.memory_space<vmem>>, vector<128x256xbf16>
    %cst = arith.constant dense<0.000000e+00> : vector<8x256xf32>
    %2 = tpu.matmul %0, %1, %cst {dimension_numbers = #tpu.dot_dimension_numbers<[1], [0], [0], [1], [0, 0, 1, 1], [], []>} : vector<8x128xbf16>, vector<128x256xbf16>, vector<8x256xf32> -> vector<8x256xf32>
    %c0_3 = arith.constant 0 : index
    %c0_4 = arith.constant 0 : index
    %3 = vector.load %arg3[%c0_3, %c0_4] : memref<1x256xf32, #tpu.memory_space<vmem>>, vector<1x256xf32>
    %4 = vector.broadcast %3 : vector<1x256xf32> to vector<8x256xf32>
    %5 = arith.addf %2, %4 : vector<8x256xf32>
    %6 = arith.truncf %5 : vector<8x256xf32> to vector<8x256xbf16>
    %7 = math.tanh %6 : vector<8x256xbf16>
    %c0_5 = arith.constant 0 : index
    %c0_6 = arith.constant 0 : index
    %8 = vector.load %arg4[%c0_5, %c0_6] : memref<256x128xbf16, #tpu.memory_space<vmem>>, vector<256x128xbf16>
    %cst_7 = arith.constant dense<0.000000e+00> : vector<8x128xf32>
    %9 = tpu.matmul %7, %8, %cst_7 {dimension_numbers = #tpu.dot_dimension_numbers<[1], [0], [0], [1], [0, 0, 1, 1], [], []>} : vector<8x256xbf16>, vector<256x128xbf16>, vector<8x128xf32> -> vector<8x128xf32>
    %c0_8 = arith.constant 0 : index
    %c0_9 = arith.constant 0 : index
    %10 = vector.load %arg5[%c0_8, %c0_9] : memref<1x128xf32, #tpu.memory_space<vmem>>, vector<1x128xf32>
    %11 = vector.broadcast %10 : vector<1x128xf32> to vector<8x128xf32>
    %12 = arith.addf %9, %11 : vector<8x128xf32>
    %cst_10 = arith.constant 0.000000e+00 : f32
    %13 = vector.broadcast %cst_10 : f32 to vector<8x128xf32>
    %14 = arith.maximumf %12, %13 : vector<8x128xf32>
    %15 = arith.truncf %14 : vector<8x128xf32> to vector<8x128xbf16>
    %c0_11 = arith.constant 0 : index
    %c0_12 = arith.constant 0 : index
    %16 = vector.load %arg6[%c0_11, %c0_12] : memref<8x128xbf16, #tpu.memory_space<vmem>>, vector<8x128xbf16>
    tpu.vector_store %arg6[%c0_11, %c0_12], %15 {strides = array<i32>} : memref<8x128xbf16, #tpu.memory_space<vmem>>, vector<8x128xbf16>,
    return
  }
  func.func @transform_0(%arg0: i32) -> (i32, i32) {
    %c0_i32 = arith.constant 0 : i32
    %c0_i32_0 = arith.constant 0 : i32
    return %arg0, %c0_i32 : i32, i32
  }
  func.func @transform_1(%arg0: i32) -> (i32, i32) {
    %c0_i32 = arith.constant 0 : i32
    %c0_i32_0 = arith.constant 0 : i32
    %c0_i32_1 = arith.constant 0 : i32
    return %c0_i32, %c0_i32_0 : i32, i32
  }
  func.func @transform_2(%arg0: i32) -> (i32, i32) {
    %c0_i32 = arith.constant 0 : i32
    %c0_i32_0 = arith.constant 0 : i32
    %c0_i32_1 = arith.constant 0 : i32
    return %c0_i32, %c0_i32_0 : i32, i32
  }
  func.func @transform_3(%arg0: i32) -> (i32, i32) {
    %c0_i32 = arith.constant 0 : i32
    %c0_i32_0 = arith.constant 0 : i32
    %c0_i32_1 = arith.constant 0 : i32
    return %c0_i32, %c0_i32_0 : i32, i32
  }
  func.func @transform_4(%arg0: i32) -> (i32, i32) {
    %c0_i32 = arith.constant 0 : i32
    %c0_i32_0 = arith.constant 0 : i32
    %c0_i32_1 = arith.constant 0 : i32
    return %c0_i32, %c0_i32_0 : i32, i32
  }
  func.func @transform_5(%arg0: i32) -> (i32, i32) {
    %c0_i32 = arith.constant 0 : i32
    %c0_i32_0 = arith.constant 0 : i32
    return %arg0, %c0_i32 : i32, i32
  }
}

</mosaic_0001>

<bundles_post_ra>
// kernel: tpu_custom_call.1
= control target key start
LH: loop header
LB: loop body
LE: loop exit
PB: predicated region body
PF: predicated region fallthrough
CT: control target
= control target key end

     0   :  { %10 = vsyncpa [#allocation3], 0  ;;  %s1259_s0 = inlined_call_operand.hbm [shape: bf16[16,128], index: 0, kind: input, shape index: {}]   ;;  %s1260_s1 = inlined_call_operand.hbm [shape: bf16[128,256], index: 1, kind: input, shape index: {}]   ;;  %s1261_s2 = inlined_call_operand.vmem [shape: f32[1,256], index: 2, kind: input, shape index: {}]   ;;  %s1262_s3 = inlined_call_operand.hbm [shape: bf16[256,128], index: 3, kind: input, shape index: {}]   ;;  %s1263_s4 = inlined_call_operand.vmem [shape: f32[1,128], index: 4, kind: input, shape index: {}]   ;;  %s1264_s5 = inlined_call_operand.hbm [shape: bf16[16,128], index: 5, kind: output, shape index: {}]  }
   0x1   :  { %12 = vsyncpa [#allocation3 + $0x1], 0 }
   0x2   :  { %13 = vsyncpa [#allocation6], 0 }
   0x3   :  { %14 = vsyncpa [#allocation4], 0 }
   0x4   :  { %16 = vsyncpa [#allocation4 + $0x1], 0  ;;  %s1081_s18 = smov 0   ;;  %s1083_s19 = smov 0  }
   0x5   :  { %s1085_s20 = smov 0   ;;  %s1087_s21 = smov 0  }
   0x6 LB: > { %s1102_s22 = sadd.s32 4294967295, %s1040_s21   ;;  %s705_s23 = sadd.s32 4294967294, %s1040_s21   ;;  %s1040_s21 = sphi %s1087_s21, %s1286_s21   ;;  %s1036_s20 = sphi %s1085_s20, %s1285_s20   ;;  %s1032_s19 = sphi %s1083_s19, %s1284_s19   ;;  %s1028_s18 = sphi %s1081_s18, %s1283_s18  }
   0x7   : > { %p42_p0 = scmp.ne.s32.totalorder %s1032_s19, %s1028_s18  ;;  %p1265_p1 = scmp.eq.s32.totalorder %s1102_s22, 0 }
   0x8   : > { %p156_p3 = scmp.eq.s32.totalorder %s705_s23, 1  ;;  %p706_p5 = scmp.ge.s32.totalorder %s1040_s21, 1 }
   0x9   : > { %p1111_p4 = por %p1265_p1, %p42_p0  ;;  %p163_p7 = scmp.lt.s32.totalorder %s1040_s21, 3 }
   0xa   : > { %p1116_p6 = por %p156_p3, %p42_p0  ;;  %s1042_s27 = smov [#allocation5]  }
   0xb   : > { %s1269_s24 = scalar_select %p1111_p4, 1, 0 }
   0xc   : > { %s1270_s25 = scalar_select %p1116_p6, 1, 0 }
   0xd   : > { %p1121_p8 = pnand %p706_p5, %p163_p7  ;;  %s175_s28 = sshll.u32 %s1042_s27, 4  ;;  %s176_s28 = int_to_ptr.vmem [resolvable:$true] %s175_s28 }
   0xe   : > { %s1043_s30 = smov [#allocation7]   ;;  %s903_s7 = scalar_lea.vmem %s176_s28, 2048 }
   0xf   : > { %s1271_s26 = scalar_select %p1121_p8, 1, 0 }
  0x10   : > { %p788_p9 = pneg %p1121_p8  ;;  %s191_s6 = sshll.u32 %s1043_s30, 4  ;;  %s192_s6 = int_to_ptr.vmem [resolvable:$true] %s191_s6 }
  0x11   : > { %p904_p13 = scmp.ne.s32.totalorder %s176_s28, %s903_s7  ;;  %p911_p5 = scmp.lt.s32.totalorder %s176_s28, %s176_s28 }
  0x12   : > { %p1130_p11 = pnand %p788_p9, %p1265_p1  ;;  %p912_p7 = scmp.lt.s32.totalorder %s903_s7, %s903_s7 }
  0x14   : > { %p894_p12 = pneg %p1130_p11  ;;  %p913_p10 = por %p912_p7, %p911_p5 }
  0x16   : > { %p906_p0 = pnand %p904_p13, %p894_p12 }
  0x18   : > { %p907_p3 = pneg %p906_p0 }
  0x1a   : > { %p914_p9 = pnand %p913_p10, %p907_p3 }
  0x1c   : > { %917 = shalt.err (!%p914_p9)
}
  0x1d   : > { %s1044_s8 = smov 128   ;;  %s1045_s9 = smov 8  }
  0x1e   : > { %791 = dma.hbm_to_vmem [thread:$0]  (!%p1130_p11), %s1260_s1, 2048, %s176_s28, [#allocation6], %s1044_s8, %s1044_s8, %s1045_s9  }
  0x1f   : > { %s929_s12 = scalar_lea.vmem %s192_s6, 2048  ;;  %p937_p2 = scmp.lt.s32.totalorder %s192_s6, %s192_s6 }
  0x20   : > { %p930_p1 = scmp.ne.s32.totalorder %s192_s6, %s929_s12  ;;  %p938_p6 = scmp.lt.s32.totalorder %s929_s12, %s929_s12 }
  0x22   : > { %p932_p13 = pnand %p930_p1, %p894_p12  ;;  %p939_p5 = por %p938_p6, %p937_p2 }
  0x24   : > { %p933_p0 = pneg %p932_p13 }
  0x26   : > { %p940_p10 = pnand %p939_p5, %p933_p0 }
  0x28   : > { %943 = shalt.err (!%p940_p10)
}
  0x29   : > { %s1046_s13 = smov 64   ;;  %s1047_s14 = smov 4  }
  0x2a   : > { %794 = dma.hbm_to_vmem [thread:$0]  (!%p1130_p11), %s1262_s3, 2048, %s192_s6, [#allocation6], %s1046_s13, %s1046_s13, %s1047_s14  }
  0x2b   : > { %s1153_s17 = sadd.s32 1, %s1040_s21   ;;  %s29_s27 = sadd.s32 1, %s1036_s20 }
  0x2c   : > { %s26_s23 = ssub.s32 %s1040_s21, %s1153_s17  ;;  %p36_p2 = scmp.ne.s32.totalorder %s1036_s20, %s1032_s19 }
  0x2d   : > { %p27_p1 = scmp.eq.s32.totalorder %s26_s23, 0  ;;  %p37_p6 = scmp.eq.s32.totalorder %s1040_s21, 0 }
  0x2e   : > { %p1273_p3 = scmp.eq.s32.totalorder %s1102_s22, 1  ;;  %p805_p9 = scmp.lt.s32.totalorder %s1040_s21, 2 }
  0x2f   : > { %s1162_s28 = scalar_select %p27_p1, %s1036_s20, %s29_s27  }
  0x30   : > { %p38_p12 = por %p37_p6, %p36_p2  ;;  %p1166_p7 = por %p1273_p3, %p36_p2 }
  0x31   : > { %s208_s29 = sand.u32 1, %s1036_s20   ;;  %s711_s6 = sshll.u32 %s1040_s21, 6 }
  0x32   : > { %s1274_s30 = scalar_select %p1166_p7, 1, 0 }
  0x33   : > { %s710_s7 = sshll.u32 %s208_s29, 2  ;;  %s1176_s10 = scalar_lea.hbm %s1259_s0, %s711_s6 }
  0x34   : > { %s212_s11 = scalar_lea.vmem [#allocation2], %s710_s7  ;;  %p1178_p11 = pnand %p805_p9, %p38_p12 }
  0x35   : > { %s219_s12 = sshll.u32 %s212_s11, 4  ;;  %s209_s14 = scalar_lea.sflag [#allocation3], %s208_s29  ;;  %s220_s12 = int_to_ptr.vmem [resolvable:$true] %s219_s12 }
  0x36   : > { %s944_s15 = scalar_lea.hbm %s1176_s10, 64  ;;  %p946_p0 = pneg %p1178_p11 }
  0x37   : > { %p945_p13 = scmp.ne.s32.totalorder %s1176_s10, %s944_s15  ;;  %s949_s27 = scalar_lea.hbm %s1259_s0, 128 }
  0x38   : > { %p950_p1 = scmp.lt.s32.totalorder %s1176_s10, %s1259_s0  ;;  %p951_p2 = scmp.lt.s32.totalorder %s949_s27, %s944_s15 }
  0x39   : > { %p947_p5 = pnand %p946_p0, %p945_p13 }
  0x3a   : > { %p952_p6 = por %p951_p2, %p950_p1 }
  0x3b   : > { %p948_p10 = pneg %p947_p5 }
  0x3d   : > { %p953_p12 = pnand %p952_p6, %p948_p10 }
  0x3f   : > { %956 = shalt.err (!%p953_p12)
}
  0x40   : > { %s957_s8 = scalar_lea.vmem %s220_s12, 64  ;;  %s1048_s29 = smov [#allocation2]  }
  0x41   : > { %p958_p3 = scmp.ne.s32.totalorder %s220_s12, %s957_s8  ;;  %s962_s9 = sshll.u32 %s1048_s29, 4  ;;  %s963_s9 = int_to_ptr.vmem [resolvable:$false] %s962_s9 }
  0x42   : > { %s964_s11 = scalar_lea.vmem %s963_s9, 128  ;;  %p965_p13 = scmp.lt.s32.totalorder %s220_s12, %s963_s9 }
  0x43   : > { %p960_p9 = pnand %p958_p3, %p946_p0  ;;  %p966_p5 = scmp.lt.s32.totalorder %s964_s11, %s957_s8 }
  0x45   : > { %p961_p7 = pneg %p960_p9  ;;  %p967_p4 = por %p966_p5, %p965_p13 }
  0x47   : > { %p968_p8 = pnand %p967_p4, %p961_p7 }
  0x49   : > { %971 = shalt.err (!%p968_p8)
}
  0x4a   : > { %798 = dma.hbm_to_vmem [thread:$0]  (!%p1178_p11), %s1176_s10, 64, %s220_s12, %s209_s14  }
  0x4b   : > { %p1276_p10 = scmp.ne.s32.totalorder %s1271_s26, 0 }
  0x4c   : > { %s1199_s15 = sand.u32 (!%p1276_p10), 1, %s1032_s19   ;;  %p1277_p4 = scmp.ne.s32.totalorder (!%p1276_p10), %s1269_s24, 0 }
  0x4d   : > { %228 = sbr.rel (%p1276_p10) target bundleno = 550 (0x226), region = 40  ;;  %s713_s16 = sshll.u32 (!%p1276_p10), %s1199_s15, 2 }
  0x4e   : > { %s231_s23 = scalar_lea.sflag (!%p1276_p10), [#allocation3], %s1199_s15  ;;  %s1205_s27 = scalar_lea.vmem (!%p1276_p10), [#allocation2], %s713_s16 }
  0x52   : > { %1015 = dma.done.wait (%p1277_p4), %s231_s23, 64  }
  0x53   : > { %1017 = vsyncadd (%p1277_p4), %s231_s23, 4294967232  ;;  %p1278_p8 = scmp.eq.s32.totalorder %s1102_s22, 0 }
  0x55   : > { %1019 = dma.done.wait (%p1278_p8), [#allocation6], 4096   ;;  %p1279_p7 = pmov %p1278_p8 }
  0x56   : > { %v1049_v0 = vmov 0   ;;  %v848_v1 = vld [vmem:[#allocation5 + $0x74] ss:$8 sps:$4 sm:$0xff]   ;;  %v850_v2 = vld [vmem:[#allocation5 + $0x70] ss:$8 sps:$4 sm:$0xff]   ;;  %v876_v15 = vld [vmem:[#allocation7 + $0x68] sm:$0xff]   ;;  %v289_v34 = vlaneseq }
  0x57   : > { %1021 = vsyncadd (%p1279_p7), [#allocation6], 4294963200  ;;  %411 = vmatprep.mubr.bf16.mxu0 %v1049_v0  ;;  %379 = vmatprep.subr.bf16.mxu0 %v848_v1  ;;  %v851_v3 = vld [vmem:[#allocation5 + $0x64] ss:$8 sps:$4 sm:$0xff]   ;;  %v853_v4 = vld [vmem:[#allocation5 + $0x60] ss:$8 sps:$4 sm:$0xff]  }
  0x58   : > { %380 = vmatpush1.bf16.msra.mxu0 %v850_v2  ;;  %v854_v5 = vld [vmem:[#allocation5 + $0x54] ss:$8 sps:$4 sm:$0xff]   ;;  %v856_v6 = vld [vmem:[#allocation5 + $0x50] ss:$8 sps:$4 sm:$0xff]   ;;  %v857_v7 = vld [vmem:[#allocation5 + $0x44] ss:$8 sps:$4 sm:$0xff]  }
  0x59   : > { %381 = vmatprep.subr.bf16.mxu0 %v851_v3  ;;  %v859_v8 = vld [vmem:[#allocation5 + $0x40] ss:$8 sps:$4 sm:$0xff]   ;;  %v860_v9 = vld [vmem:[#allocation5 + $0x34] ss:$8 sps:$4 sm:$0xff]   ;;  %v862_v12 = vld [vmem:[#allocation5 + $0x30] ss:$8 sps:$4 sm:$0xff]  }
  0x5a   : > { %v872_v10 = vld [vmem:[#allocation7 + $0x78] sm:$0xff]   ;;  %v874_v13 = vld [vmem:[#allocation7 + $0x70] sm:$0xff]   ;;  %v863_v16 = vld [vmem:[#allocation5 + $0x24] ss:$8 sps:$4 sm:$0xff]   ;;  %v290_v35 = vshrl.u32 %v289_v34, 7  ;;  %s751_s13 = sshll.u32 %s1102_s22, 6 }
  0x5b   : > { %v873_v11 = vld [vmem:[#allocation7 + $0x38] sm:$0xff]   ;;  %754 = vmatprep.subr.bf16.mxu1 %v872_v10  ;;  %v875_v14 = vld [vmem:[#allocation7 + $0x30] sm:$0xff]   ;;  %v865_v17 = vld [vmem:[#allocation5 + $0x20] ss:$8 sps:$4 sm:$0xff]   ;;  %s268_s14 = scalar_lea.vmem [#allocation8], %s713_s16  ;;  %s614_s29 = scalar_lea.hbm %s1264_s5, %s751_s13 }
  0x5c   : > { %382 = vmatpush1.bf16.msra.mxu0 %v853_v4  ;;  %755 = vmatpush3.bf16.msra.mxu1 %v873_v11  ;;  %v866_v18 = vld [vmem:[#allocation5 + $0x14] ss:$8 sps:$4 sm:$0xff]   ;;  %v868_v19 = vld [vmem:[#allocation5 + $0x10] ss:$8 sps:$4 sm:$0xff]   ;;  %v869_v20 = vld [vmem:[#allocation5 + $0x4] ss:$8 sps:$4 sm:$0xff]  }
  0x5d   : > { %383 = vmatprep.subr.bf16.mxu0 %v854_v5  ;;  %756 = vmatprep.subr.bf16.mxu1 %v874_v13  ;;  %v871_v21 = vld [vmem:[#allocation5] ss:$8 sps:$4 sm:$0xff]   ;;  %v270_v22 = vld [vmem:[%s1205_s27] sm:$0xf]  ;;  %v882_v28 = vld [vmem:[#allocation7 + $0x50] sm:$0xff]   ;;  %v291_v36 = vsub.s32 0, %v290_v35 }
  0x5e   : > { %v877_v23 = vld [vmem:[#allocation7 + $0x28] sm:$0xff]   ;;  %v878_v24 = vld [vmem:[#allocation7 + $0x60] sm:$0xff]   ;;  %v880_v26 = vld [vmem:[#allocation7 + $0x58] sm:$0xff]   ;;  %v295_v38 = vsub.s32 1, %v290_v35  ;;  %s616_s6 = sshll.u32 %s268_s14, 4  ;;  %s603_s9 = scalar_lea.sflag [#allocation4], %s1199_s15  ;;  %s617_s6 = int_to_ptr.vmem [resolvable:$true] %s616_s6 }
  0x5f   : > { %v879_v25 = vld [vmem:[#allocation7 + $0x20] sm:$0xff]   ;;  %v881_v27 = vld [vmem:[#allocation7 + $0x18] sm:$0xff]   ;;  %v883_v29 = vld [vmem:[#allocation7 + $0x10] sm:$0xff]   ;;  %s972_s11 = scalar_lea.vmem %s617_s6, 64  ;;  %p1280_p0 = scmp.ne.s32.totalorder %s1274_s30, 0 }
  0x60   : > { %384 = vmatpush1.bf16.msra.mxu0 %v856_v6  ;;  %757 = vmatpush3.bf16.msra.mxu1 %v875_v14  ;;  %v884_v30 = vld [vmem:[#allocation7 + $0x48] sm:$0xff]   ;;  %v886_v32 = vld [vmem:[#allocation7 + $0x40] sm:$0xff]   ;;  %v287_v37 = vld [vmem:[%s1261_s2] sm:$0x3]  ;;  %p973_p11 = scmp.ne.s32.totalorder %s617_s6, %s972_s11  ;;  %s1050_s23 = smov [#allocation8]  }
  0x61   : > { %385 = vmatprep.subr.bf16.mxu0 %v857_v7  ;;  %758 = vmatprep.subr.bf16.mxu1 %v876_v15  ;;  %v885_v31 = vld [vmem:[#allocation7 + $0x8] sm:$0xff]   ;;  %v887_v33 = vld [vmem:[#allocation7] sm:$0xff]   ;;  %v292_v39 = vrot.slane %v287_v37, %v291_v36  ;;  %v296_v40 = vrot.slane %v287_v37, %v295_v38  ;;  %v733_v52 = vld [vmem:[%s1263_s4] ss:$0 sm:$0xff]  ;;  %s976_s27 = sshll.u32 %s1050_s23, 4  ;;  %s977_s27 = int_to_ptr.vmem [resolvable:$false] %s976_s27 }
  0x62   : > { %p974_p1 = pnand %p973_p11, %p1280_p0  ;;  %s978_s22 = scalar_lea.vmem %s977_s27, 128 }
  0x63   : > { %p979_p6 = scmp.lt.s32.totalorder %s617_s6, %s977_s27  ;;  %p980_p12 = scmp.lt.s32.totalorder %s978_s22, %s972_s11 }
  0x64   : > { %386 = vmatpush1.bf16.msra.mxu0 %v859_v8  ;;  %759 = vmatpush3.bf16.msra.mxu1 %v877_v23  ;;  %p975_p2 = pneg %p974_p1 }
  0x65   : > { %387 = vmatprep.subr.bf16.mxu0 %v860_v9  ;;  %760 = vmatprep.subr.bf16.mxu1 %v878_v24  ;;  %p981_p3 = por %p980_p12, %p979_p6 }
  0x67   : > { %p982_p9 = pnand %p981_p3, %p975_p2 }
  0x68   : > { %388 = vmatpush1.bf16.msra.mxu0 %v862_v12  ;;  %761 = vmatpush3.bf16.msra.mxu1 %v879_v25 }
  0x69   : > { %389 = vmatprep.subr.bf16.mxu0 %v863_v16  ;;  %762 = vmatprep.subr.bf16.mxu1 %v880_v26 }
  0x6c   : > { %390 = vmatpush1.bf16.msra.mxu0 %v865_v17  ;;  %763 = vmatpush3.bf16.msra.mxu1 %v881_v27 }
  0x6d   : > { %391 = vmatprep.subr.bf16.mxu0 %v866_v18  ;;  %764 = vmatprep.subr.bf16.mxu1 %v882_v28 }
  0x70   : > { %392 = vmatpush1.bf16.msra.mxu0 %v868_v19  ;;  %765 = vmatpush3.bf16.msra.mxu1 %v883_v29 }
  0x71   : > { %393 = vmatprep.subr.bf16.mxu0 %v869_v20  ;;  %766 = vmatprep.subr.bf16.mxu1 %v884_v30 }
  0x74   : > { %394 = vmatpush1.bf16.msra.mxu0 %v871_v21  ;;  %767 = vmatpush3.bf16.msra.mxu1 %v885_v31 }
  0x75   : > { %768 = vmatprep.subr.bf16.mxu1 %v886_v32 }
  0x77   : > { %412 = vmatmul.mubr.bf16.vlgmr.msra.gmra.mxu0 %v270_v22 }
  0x78   : > { %769 = vmatpush3.bf16.msra.mxu1 %v887_v33 }
 0x137   : > { %v413_v41 = vpop.f32.mrf.mxu0 }
 0x138   : > { %v414_v42 = vadd.f32 %v413_v41, %v292_v39 }
 0x139   : > { %v415_v43 = vpop.f32.mrf.mxu0 }
 0x13a   : > { %v416_v44 = vadd.f32 %v415_v43, %v296_v40  ;;  %v420_v45 = vpack.c.bf16 %v414_v42, %v414_v42 }
 0x13b   : > { %v417_v46 = vpop.f32.mrf.mxu0 }
 0x13c   : > { %v421_v47 = vpack.c.bf16 %v416_v44, %v416_v44 }
 0x13d   : > { %v418_v48 = vpop.f32.mrf.mxu0 }
 0x13e   : > { %888 = vtanh.bf16 %v421_v47 }
 0x13f   : > { %890 = vtanh.bf16 %v420_v45 }
 0x14c   : > { %v889_v49 = vpop.eup %888 }
 0x14d   : > { %v891_v50 = vpop.eup %890  ;;  %591 = vmatprep.mubr.bf16.mxu1 %v889_v49 }
 0x14e   : > { %592 = vmatmul.mubr.bf16.vlgmr.msra.gmra.mxu1 %v891_v50 }
 0x20e   : > { %v770_v51 = vpop.f32.mrf.mxu1 }
 0x210   : > { %v771_v53 = vpop.f32.mrf.mxu1 }
 0x211   : > { %v772_v54 = vadd.f32 %v771_v53, %v770_v51 }
 0x212   : > { %v773_v55 = vpop.f32.mrf.mxu1 }
 0x213   : > { %v594_v56 = vadd.f32 %v772_v54, %v733_v52 }
 0x214   : > { %v774_v57 = vpop.f32.mrf.mxu1 }
 0x215   : > { %v599_v58 = vmax.f32 %v594_v56, 0.0 }
 0x217   : > { %v600_v59 = vpack.c.bf16 %v599_v58, %v599_v58 }
 0x219   : > { %601 = vst [vmem:[%s268_s14] sm:$0xf] %v600_v59 }
 0x21a   : > { %985 = shalt.err (!%p982_p9)
}
 0x21b   : > { %s986_s16 = scalar_lea.hbm %s614_s29, 64  ;;  %s990_s26 = scalar_lea.hbm %s1264_s5, 128 }
 0x21c   : > { %p987_p13 = scmp.ne.s32.totalorder %s614_s29, %s986_s16  ;;  %p991_p4 = scmp.lt.s32.totalorder %s614_s29, %s1264_s5 }
 0x21d   : > { %p992_p8 = scmp.lt.s32.totalorder %s990_s26, %s986_s16 }
 0x21e   : > { %p988_p5 = pnand %p987_p13, %p1280_p0 }
 0x21f   : > { %p993_p7 = por %p992_p8, %p991_p4 }
 0x220   : > { %p989_p10 = pneg %p988_p5 }
 0x222   : > { %p994_p11 = pnand %p993_p7, %p989_p10 }
 0x224   : > { %997 = shalt.err (!%p994_p11)
}
 0x225   : > { %786 = dma.vmem_to_hbm [thread:$0]  (%p1280_p0), %s617_s6, 64, %s614_s29, %s603_s9  }
 0x226 PF: > { %s628_s13 = sand.u32 1, %s1028_s18   ;;  %p1281_p1 = scmp.ne.s32.totalorder %s1270_s25, 0 }
 0x227   : > { %p1282_p2 = scmp.ge.s32.totalorder %s1040_s21, 2  ;;  %s629_s14 = scalar_lea.sflag [#allocation4], %s628_s13 }
 0x229   : > { %p800_p6 = pnand %p1282_p2, %p1281_p1 }
 0x22b   : > { %p801_p12 = pneg %p800_p6 }
 0x22d   : > { %1023 = dma.done.wait (%p801_p12), %s629_s14, 64  }
 0x22e   : > { %1025 = vsyncadd (%p801_p12), %s629_s14, 4294967232  ;;  %p19_p3 = scmp.ge.s32.totalorder %s1153_s17, 4   ;;  %s1283_s18 = smov %s1032_s19 }
 0x22f   : > { %s1284_s19 = smov %s1036_s20  ;;  %s1285_s20 = smov %s1162_s28 }
 0x230   : > { %s1286_s21 = smov %s1153_s17  ;;  %21 = sbr.rel (!%p19_p3) target bundleno = 6 (0x6), region = 93 }
 0x235   :  { %634 = vsyncpa [#allocation3], 1 }
 0x236   :  { %636 = vsyncpa [#allocation3 + $0x1], 1 }
 0x237   :  { %637 = vsyncpa [#allocation6], 1 }
 0x238   :  { %638 = vsyncpa [#allocation4], 1 }
 0x239   :  { %640 = vsyncpa [#allocation4 + $0x1], 1 }

</bundles_post_ra>
